<compile_context>
chip_gen: v7x
topology: tpu7x:2x2x1
jax: 0.10.0
libtpu: 0.0.40
codegen_flags: <defaults>
</compile_context>

<pallas_src>
import functools
import math

import jax
import jax.numpy as jnp
from jax.experimental import pallas as pl
from jax.experimental.pallas import tpu as pltpu

TINY = 1.1754943508222875e-38  # torch's float32 min-normal clamp value

_TARGET_TILE_BYTES = 4 << 20   # ~4 MiB per x/out tile -> near HBM roofline
_MAX_FLAT_LANES = 64 * 1024    # above this, flatten-to-lcm rows get too wide
_MIN_PALLAS_BYTES = 1 << 20    # below this the op is overhead-bound: plain jnp


# ---------------------------------------------------------------------------
# Kernels (pure elementwise VPU/EUP work; firmly memory-bound)
# ---------------------------------------------------------------------------
def _tanh_squash_fwd_kernel(x_ref, loc_ref, scale_ref, o_ref):
    # out = loc + tanh(x) * scale   (tanh -> EUP slot, mul/add -> VPU slots)
    o_ref[...] = (loc_ref[...] + jnp.tanh(x_ref[...]) * scale_ref[...]).astype(o_ref.dtype)


def _tanh_squash_rev_kernel(x_ref, loc_ref, inv_scale_ref, o_ref):
    # y = (x - loc) * (1/scale); 1/scale precomputed on host so the EUP only
    # carries the two logs.  Matches torch numerically (not bit-exactly).
    y = (x_ref[...] - loc_ref[...]) * inv_scale_ref[...]
    out = (jnp.log(jnp.maximum(1.0 + y, TINY)) -
           jnp.log(jnp.maximum(1.0 - y, TINY))) * 0.5
    o_ref[...] = out.astype(o_ref.dtype)


# ---------------------------------------------------------------------------
# Generation-aware VMEM budgets
# ---------------------------------------------------------------------------
@functools.lru_cache(maxsize=1)
def _gen_budgets():
    """Returns (tile_budget_bytes, vmem_limit_bytes) for the local TPU gen."""
    try:
        vmem = int(pltpu.get_tpu_info().vmem_capacity_bytes)
    except Exception:
        vmem = 64 << 20  # conservative: assume the smallest (v7x-class) part
    if vmem >= (128 << 20):       # v5e / v6e: 128 MiB VMEM
        return 48 << 20, 64 << 20
    return 16 << 20, 32 << 20     # v7x: 64 MiB physical, 32 MiB scoped default


# ---------------------------------------------------------------------------
# Layout planning (depends only on D -> hoisted into __init__)
# ---------------------------------------------------------------------------
def _plan_layout(D):
    """Pick a lane-dense presentation of row-major (B, D) data.

    Returns (mode, L) with L % 128 == 0 in all modes:
      "native": D already a multiple of 128; view is (B, D).
      "flat":   small D; flatten + zero-pad to an (R, L=lcm(D,128)) slab whose
                per-row loc/scale pattern repeats exactly L // D times.
      "colpad": large D; zero-pad columns to the next multiple of 128.
    """
    if D % 128 == 0:
        return "native", D
    L = math.lcm(D, 128)
    if L <= _MAX_FLAT_LANES:
        return "flat", L
    return "colpad", -(-D // 128) * 128


def _choose_row_tile(R, L, dtype_bytes, tile_budget):
    """Largest sublane-aligned row tile that (a) targets ~4 MiB per x/out tile,
    (b) keeps the 2x(in)+2x(out) double-buffered tiles under the VMEM budget,
    and (c) leaves >= 2 (ideally >= 4) grid steps so megacore sharding and
    DMA/compute pipelining actually engage."""
    bytes_per_row = max(1, L * dtype_bytes)
    target_rows = max(1, _TARGET_TILE_BYTES // bytes_per_row)
    budget_rows = max(1, tile_budget // (4 * bytes_per_row))
    tr = min(R, target_rows, budget_rows)
    if R >= 16:
        min_steps = 4 if R >= 32 else 2
        tr = min(tr, max(8, -(-R // min_steps)))
    if tr < R:
        tr = max(8, (tr // 8) * 8)  # partial tiles must be sublane-aligned
    return min(tr, R)


# ---------------------------------------------------------------------------
# Pallas call on a lane-dense (R, L) slab
# ---------------------------------------------------------------------------
def _pallas_rows(x2, loc_row, aux_row, kernel, tile_budget, vmem_limit):
    R, L = x2.shape
    tr = _choose_row_tile(R, L, x2.dtype.itemsize, tile_budget)
    return pl.pallas_call(
        kernel,
        out_shape=jax.ShapeDtypeStruct((R, L), x2.dtype),
        grid=(pl.cdiv(R, tr),),
        in_specs=[
            pl.BlockSpec((tr, L), lambda i: (i, 0)),   # x row tile
            pl.BlockSpec((1, L), lambda i: (0, 0)),    # loc row (broadcast)
            pl.BlockSpec((1, L), lambda i: (0, 0)),    # scale / 1/scale row
        ],
        out_specs=pl.BlockSpec((tr, L), lambda i: (i, 0)),
        compiler_params=pltpu.CompilerParams(
            dimension_semantics=("parallel",),   # shard row tiles across TCs (v7x)
            vmem_limit_bytes=vmem_limit,
        ),
    )(x2, loc_row, aux_row)


# ---------------------------------------------------------------------------
# Jitted per-call implementation
# ---------------------------------------------------------------------------
def _tanh_squash_impl(x, loc, scale, loc_row, aux_row, *, reverse, mode, lanes,
                      tile_budget, vmem_limit, min_pallas_bytes):
    B, D = x.shape

    if B * D * x.dtype.itemsize < min_pallas_bytes:
        # Overhead-bound regime: a standalone kernel launch costs more than the
        # math; let XLA fuse the plain expression (ideally into the producer).
        if reverse:
            y = (x - loc) / scale
            return (jnp.log(jnp.maximum(1.0 + y, TINY)) -
                    jnp.log(jnp.maximum(1.0 - y, TINY))) * 0.5
        return loc + jnp.tanh(x) * scale

    kernel = _tanh_squash_rev_kernel if reverse else _tanh_squash_fwd_kernel

    if mode == "native":
        return _pallas_rows(x, loc_row, aux_row, kernel, tile_budget, vmem_limit)

    if mode == "flat":
        n = B * D
        n_pad = -(-n // lanes) * lanes
        flat = x.reshape(n)
        if n_pad != n:
            flat = jnp.pad(flat, (0, n_pad - n))
        out2 = _pallas_rows(flat.reshape(n_pad // lanes, lanes),
                            loc_row, aux_row, kernel, tile_budget, vmem_limit)
        out_flat = out2.reshape(n_pad)
        if n_pad != n:
            out_flat = out_flat[:n]
        return out_flat.reshape(B, D)

    # mode == "colpad": zero-pad columns up to the next multiple of 128.
    out2 = _pallas_rows(jnp.pad(x, ((0, 0), (0, lanes - D))),
                        loc_row, aux_row, kernel, tile_budget, vmem_limit)
    return out2[:, :D]


_tanh_squash_jit = jax.jit(
    _tanh_squash_impl,
    static_argnames=("reverse", "mode", "lanes", "tile_budget",
                     "vmem_limit", "min_pallas_bytes"),
)


# ---------------------------------------------------------------------------
# Module mirror
# ---------------------------------------------------------------------------
class TanhSquashPallas:
    """Mirror of nnrl TanhSquash: buffers loc=(high+low)/2, scale=(high-low)/2.

    All layout prep (lane-dense loc/scale rows, 1/scale) is hoisted here so the
    jitted per-call path only pads/reshapes x and runs the kernel.
    """

    def __init__(self, low, high, *, min_pallas_bytes=_MIN_PALLAS_BYTES):
        low = jnp.asarray(low, jnp.float32)
        high = jnp.asarray(high, jnp.float32)
        self.loc = (high + low) / 2.0
        self.scale = (high - low) / 2.0
        self.min_pallas_bytes = int(min_pallas_bytes)

        D = self.loc.shape[-1]
        self._mode, self._lanes = _plan_layout(D)
        L = self._lanes
        if self._mode == "colpad":
            pad = L - D
            loc_row = jnp.pad(self.loc, (0, pad))
            scale_row = jnp.pad(self.scale, (0, pad), constant_values=1.0)
        else:
            reps = L // D
            loc_row = jnp.tile(self.loc, reps)
            scale_row = jnp.tile(self.scale, reps)
        self._loc_row = loc_row.reshape(1, L)
        self._scale_row = scale_row.reshape(1, L)
        # NOTE: scale == 0 (high == low) yields inf here, matching the
        # divide-by-zero behaviour of the torch reverse path.
        self._inv_scale_row = (1.0 / scale_row).reshape(1, L)

        self._tile_budget, self._vmem_limit = _gen_budgets()

    def __call__(self, inputs, reverse: bool = False):
        aux_row = self._inv_scale_row if reverse else self._scale_row
        return _tanh_squash_jit(
            inputs, self.loc, self.scale, self._loc_row, aux_row,
            reverse=bool(reverse), mode=self._mode, lanes=self._lanes,
            tile_budget=self._tile_budget, vmem_limit=self._vmem_limit,
            min_pallas_bytes=self.min_pallas_bytes,
        )


# ---------------------------------------------------------------------------
# Self-test
# ---------------------------------------------------------------------------
if __name__ == "__main__":
    key = jax.random.PRNGKey(0)

    def reference(x, loc, scale, reverse=False):
        if reverse:
            y = (x - loc) / scale
            return (jnp.log(jnp.maximum(1.0 + y, TINY)) -
                    jnp.log(jnp.maximum(1.0 - y, TINY))) / 2.0
        return loc + jnp.tanh(x) * scale

    # Cover all three lane-dense layouts:
    #   (64, 128)  -> native (D multiple of 128)
    #   (64, 8)    -> flat repack, no padding
    #   (13, 6)    -> flat repack with zero padding
    #   (16, 1031) -> column padding (large non-128-multiple D)
    cases = [(64, 128), (64, 8), (13, 6), (16, 1031)]
    for (B, D) in cases:
        k1, k2, k3, key = jax.random.split(key, 4)
        low = -1.0 - jax.random.uniform(k1, (D,), jnp.float32)   # in [-2, -1)
        high = 1.0 + jax.random.uniform(k2, (D,), jnp.float32)   # in [1, 2)
        x = jax.random.normal(k3, (B, D), jnp.float32)
        loc = (high + low) / 2.0
        scale = (high - low) / 2.0

        # Force the Pallas path even at these tiny test sizes (the default
        # size gate would otherwise route them to the fused jnp expression).
        mod = TanhSquashPallas(low, high, min_pallas_bytes=0)

        out = jax.block_until_ready(mod(x))
        assert jnp.allclose(out, reference(x, loc, scale),
                            atol=1e-5, rtol=1e-5), f"forward mismatch B={B} D={D}"

        rec = jax.block_until_ready(mod(out, reverse=True))
        assert jnp.allclose(rec, reference(out, loc, scale, reverse=True),
                            atol=1e-4, rtol=1e-5), f"reverse mismatch B={B} D={D}"

    # Default size gate: tiny inputs skip pallas_call and use the plain jnp path.
    mod_gated = TanhSquashPallas(low, high)
    out_g = jax.block_until_ready(mod_gated(x))
    assert jnp.allclose(out_g, reference(x, loc, scale), atol=1e-5, rtol=1e-5)

    print("KERNEL_OK")
</pallas_src>

<mosaic_0001>
module attributes {stable_mosaic.version = 11 : i64} {
  func.func @_tanh_squash_fwd_kernel(%arg0: i32, %arg1: memref<16x128xf32, #tpu.memory_space<vmem>>, %arg2: memref<1x128xf32, #tpu.memory_space<vmem>>, %arg3: memref<1x128xf32, #tpu.memory_space<vmem>>, %arg4: memref<16x128xf32, #tpu.memory_space<vmem>>) attributes {dimension_semantics = [#tpu.dimension_semantics<parallel>], iteration_bounds = array<i64: 4>, scalar_prefetch = 0 : i64, scratch_operands = 0 : i64, tpu.core_type = #tpu.core_type<tc>, window_params = [{transform_indices = @transform_0, window_bounds = array<i64: 16, 128>}, {pipeline_mode = #tpu.pipeline_mode<synchronous>, transform_indices = @transform_1, window_bounds = array<i64: 1, 128>}, {pipeline_mode = #tpu.pipeline_mode<synchronous>, transform_indices = @transform_2, window_bounds = array<i64: 1, 128>}, {transform_indices = @transform_3, window_bounds = array<i64: 16, 128>}]} {
    %c0 = arith.constant 0 : index
    %c0_0 = arith.constant 0 : index
    %0 = vector.load %arg2[%c0, %c0_0] : memref<1x128xf32, #tpu.memory_space<vmem>>, vector<1x128xf32>
    %c0_1 = arith.constant 0 : index
    %c0_2 = arith.constant 0 : index
    %1 = vector.load %arg1[%c0_1, %c0_2] : memref<16x128xf32, #tpu.memory_space<vmem>>, vector<16x128xf32>
    %2 = math.tanh %1 : vector<16x128xf32>
    %c0_3 = arith.constant 0 : index
    %c0_4 = arith.constant 0 : index
    %3 = vector.load %arg3[%c0_3, %c0_4] : memref<1x128xf32, #tpu.memory_space<vmem>>, vector<1x128xf32>
    %4 = vector.broadcast %3 : vector<1x128xf32> to vector<16x128xf32>
    %5 = arith.mulf %2, %4 : vector<16x128xf32>
    %6 = vector.broadcast %0 : vector<1x128xf32> to vector<16x128xf32>
    %7 = arith.addf %6, %5 : vector<16x128xf32>
    %c0_5 = arith.constant 0 : index
    %c0_6 = arith.constant 0 : index
    %8 = vector.load %arg4[%c0_5, %c0_6] : memref<16x128xf32, #tpu.memory_space<vmem>>, vector<16x128xf32>
    tpu.vector_store %arg4[%c0_5, %c0_6], %7 {strides = array<i32>} : memref<16x128xf32, #tpu.memory_space<vmem>>, vector<16x128xf32>,
    return
  }
  func.func @transform_0(%arg0: i32) -> (i32, i32) {
    %c0_i32 = arith.constant 0 : i32
    %c0_i32_0 = arith.constant 0 : i32
    return %arg0, %c0_i32 : i32, i32
  }
  func.func @transform_1(%arg0: i32) -> (i32, i32) {
    %c0_i32 = arith.constant 0 : i32
    %c0_i32_0 = arith.constant 0 : i32
    %c0_i32_1 = arith.constant 0 : i32
    return %c0_i32, %c0_i32_0 : i32, i32
  }
  func.func @transform_2(%arg0: i32) -> (i32, i32) {
    %c0_i32 = arith.constant 0 : i32
    %c0_i32_0 = arith.constant 0 : i32
    %c0_i32_1 = arith.constant 0 : i32
    return %c0_i32, %c0_i32_0 : i32, i32
  }
  func.func @transform_3(%arg0: i32) -> (i32, i32) {
    %c0_i32 = arith.constant 0 : i32
    %c0_i32_0 = arith.constant 0 : i32
    return %arg0, %c0_i32 : i32, i32
  }
}

</mosaic_0001>

<bundles_post_ra>
// kernel: _tanh_squash_impl.1
= control target key start
LH: loop header
LB: loop body
LE: loop exit
PB: predicated region body
PF: predicated region fallthrough
CT: control target
= control target key end

     0   :  { %8 = vsyncpa [#allocation3], 0  ;;  %s664_s0 = inlined_call_operand.hbm [shape: f32[64,128], index: 0, kind: input, shape index: {}]   ;;  %s665_s1 = inlined_call_operand.vmem [shape: f32[1,128], index: 1, kind: input, shape index: {}]   ;;  %s666_s2 = inlined_call_operand.vmem [shape: f32[1,128], index: 2, kind: input, shape index: {}]   ;;  %s667_s3 = inlined_call_operand.hbm [shape: f32[64,128], index: 3, kind: output, shape index: {}]  }
   0x1   :  { %10 = vsyncpa [#allocation3 + $0x1], 0 }
   0x2   :  { %11 = vsyncpa [#allocation4], 0 }
   0x3   :  { %13 = vsyncpa [#allocation4 + $0x1], 0  ;;  %s498_s12 = smov 0   ;;  %s500_s13 = smov 0  }
   0x4   :  { %s502_s14 = smov 0   ;;  %s504_s15 = smov 0  }
   0x5 LB: > { %s519_s16 = sadd.s32 4294967295, %s470_s15   ;;  %s302_s17 = sadd.s32 4294967294, %s470_s15   ;;  %s470_s15 = sphi %s504_s15, %s679_s15   ;;  %s466_s14 = sphi %s502_s14, %s678_s14   ;;  %s462_s13 = sphi %s500_s13, %s677_s13   ;;  %s458_s12 = sphi %s498_s12, %s676_s12  }
   0x6   : > { %s523_s18 = sadd.s32 1, %s470_s15   ;;  %s26_s19 = sadd.s32 1, %s466_s14 }
   0x7   : > { %s23_s20 = ssub.s32 %s470_s15, %s523_s18  ;;  %p33_p0 = scmp.ne.s32.totalorder %s466_s14, %s462_s13 }
   0x8   : > { %p24_p1 = scmp.eq.s32.totalorder %s23_s20, 0  ;;  %p34_p2 = scmp.eq.s32.totalorder %s470_s15, 0 }
   0x9   : > { %p39_p3 = scmp.ne.s32.totalorder %s462_s13, %s458_s12  ;;  %p40_p4 = scmp.eq.s32.totalorder %s519_s16, 0 }
   0xa   : > { %s535_s21 = scalar_select %p24_p1, %s466_s14, %s26_s19  }
   0xb   : > { %p537_p5 = por %p34_p2, %p33_p0  ;;  %p541_p6 = por %p40_p4, %p39_p3 }
   0xc   : > { %p105_p7 = scmp.eq.s32.totalorder %s519_s16, 3  ;;  %p111_p8 = scmp.eq.s32.totalorder %s302_s17, 3 }
   0xd   : > { %p332_p9 = scmp.lt.s32.totalorder %s470_s15, 4  ;;  %s137_s26 = sand.u32 1, %s466_s14  }
   0xe   : > { %p547_p10 = por %p105_p7, %p33_p0  ;;  %p551_p11 = por %p111_p8, %p39_p3 }
   0xf   : > { %s318_s27 = sshll.u32 %s470_s15, 8  ;;  %s305_s28 = sshll.u32 %s137_s26, 4 }
  0x10   : > { %s671_s24 = scalar_select %p547_p10, 1, 0 }
  0x11   : > { %s672_s25 = scalar_select %p551_p11, 1, 0 }
  0x12   : > { %s560_s4 = scalar_lea.hbm %s664_s0, %s318_s27  ;;  %s141_s5 = scalar_lea.vmem [#allocation2], %s305_s28 }
  0x13   : > { %s148_s6 = sshll.u32 %s141_s5, 4  ;;  %p564_p12 = pnand %p332_p9, %p537_p5  ;;  %s568_s6 = int_to_ptr.vmem [resolvable:$true] %s148_s6 }
  0x14   : > { %s570_s8 = scalar_lea.sflag [#allocation3], %s137_s26  ;;  %s374_s9 = scalar_lea.hbm %s560_s4, 256 }
  0x15   : > { %p375_p13 = scmp.ne.s32.totalorder %s560_s4, %s374_s9  ;;  %p376_p0 = pneg %p564_p12 }
  0x16   : > { %s379_s17 = scalar_lea.hbm %s664_s0, 1024  ;;  %p380_p3 = scmp.lt.u32.totalorder %s560_s4, %s664_s0 }
  0x17   : > { %p377_p1 = pnand %p376_p0, %p375_p13  ;;  %p381_p4 = scmp.lt.u32.totalorder %s379_s17, %s374_s9 }
  0x18   : > { %p383_p7 = scmp.lt.u32.totalorder %s374_s9, %s560_s4 }
  0x19   : > { %p378_p2 = pneg %p377_p1  ;;  %p382_p5 = por %p381_p4, %p380_p3 }
  0x1b   : > { %p384_p8 = por %p383_p7, %p382_p5 }
  0x1d   : > { %p385_p9 = pnand %p384_p8, %p378_p2 }
  0x1f   : > { %388 = shalt.err (!%p385_p9)
}
  0x20   : > { %s389_s22 = scalar_lea.vmem %s568_s6, 256  ;;  %s472_s26 = smov [#allocation2]  }
  0x21   : > { %p390_p13 = scmp.ne.s32.totalorder %s568_s6, %s389_s22  ;;  %s394_s27 = sshll.u32 %s472_s26, 4  ;;  %s395_s27 = int_to_ptr.vmem [resolvable:$false] %s394_s27 }
  0x22   : > { %s396_s28 = scalar_lea.vmem %s395_s27, 512  ;;  %p397_p10 = scmp.lt.s32.totalorder %s568_s6, %s395_s27 }
  0x23   : > { %p392_p1 = pnand %p390_p13, %p376_p0  ;;  %p398_p3 = scmp.lt.s32.totalorder %s396_s28, %s389_s22 }
  0x25   : > { %p393_p11 = pneg %p392_p1  ;;  %p399_p4 = por %p398_p3, %p397_p10 }
  0x27   : > { %p400_p5 = pnand %p399_p4, %p393_p11 }
  0x29   : > { %403 = shalt.err (!%p400_p5)
}
  0x2a   : > { %s473_s29 = smov 128   ;;  %s474_s30 = smov 8  }
  0x2b   : > { %327 = dma.hbm_to_vmem [thread:$0]  (!%p564_p12), %s560_s4, 256, %s568_s6, %s570_s8, %s473_s29, %s473_s29, %s474_s30  }
  0x2c   : > { %p308_p0 = scmp.ge.s32.totalorder %s470_s15, 1  ;;  %p156_p2 = scmp.lt.s32.totalorder %s470_s15, 5 }
  0x2e   : > { %p157_p7 = pnand %p308_p0, %p156_p2 }
  0x2f   : > { %s601_s5 = sand.u32 (!%p157_p7), 1, %s462_s13  }
  0x30   : > { %160 = sbr.rel (%p157_p7) target bundleno = 88 (0x58), region = 32  ;;  %s309_s9 = sshll.u32 (!%p157_p7), %s601_s5, 4 }
  0x31   : > { %s163_s10 = scalar_lea.sflag (!%p157_p7), [#allocation3], %s601_s5  ;;  %s166_s11 = scalar_lea.vmem (!%p157_p7), [#allocation2], %s309_s9 }
  0x37   : > { %449 = dma.done.wait (%p541_p6), %s163_s10, 256  }
  0x38   : > { %451 = vsyncadd (%p541_p6), %s163_s10, 4294967040  ;;  %v192_v0 = vld [vmem:[%s166_s11] sm:$0xff]  ;;  %v193_v1 = vld [vmem:[%s166_s11 + $0x8] sm:$0xff]  ;;  %s188_s17 = scalar_lea.vmem [#allocation5], %s309_s9  ;;  %s319_s23 = sshll.u32 %s519_s16, 8 }
  0x39   : > { %370 = vtanh.f32 %v192_v0  ;;  %v311_v2 = vld [vmem:[%s666_s2] ss:$0 sm:$0xff]  ;;  %s229_s19 = sshll.u32 %s188_s17, 4  ;;  %s621_s26 = scalar_lea.hbm %s667_s3, %s319_s23  ;;  %s616_s19 = int_to_ptr.vmem [resolvable:$true] %s229_s19 }
  0x3a   : > { %372 = vtanh.f32 %v193_v1  ;;  %v312_v4 = vld [vmem:[%s665_s1] ss:$0 sm:$0xff]  ;;  %s216_s27 = scalar_lea.sflag [#allocation4], %s601_s5  ;;  %s404_s28 = scalar_lea.vmem %s616_s19, 256 }
  0x3b   : > { %p405_p6 = scmp.ne.s32.totalorder %s616_s19, %s404_s28  ;;  %p674_p10 = scmp.ne.s32.totalorder %s671_s24, 0 }
  0x3c   : > { %s475_s16 = smov [#allocation5]  }
  0x3d   : > { %p406_p11 = pnand %p405_p6, %p674_p10  ;;  %s408_s29 = sshll.u32 %s475_s16, 4  ;;  %s409_s29 = int_to_ptr.vmem [resolvable:$false] %s408_s29 }
  0x3e   : > { %s410_s30 = scalar_lea.vmem %s409_s29, 512  ;;  %p411_p8 = scmp.lt.s32.totalorder %s616_s19, %s409_s29 }
  0x3f   : > { %p407_p12 = pneg %p406_p11  ;;  %p412_p9 = scmp.lt.s32.totalorder %s410_s30, %s404_s28 }
  0x41   : > { %p413_p13 = por %p412_p9, %p411_p8 }
  0x43   : > { %v371_v3 = vpop.eup %370  ;;  %p414_p1 = pnand %p413_p13, %p407_p12 }
  0x44   : > { %v373_v5 = vpop.eup %372  ;;  %v203_v6 = vmul.f32 %v371_v3, %v311_v2 }
  0x45   : > { %v204_v7 = vmul.f32 %v373_v5, %v311_v2 }
  0x46   : > { %v211_v8 = vadd.f32 %v312_v4, %v203_v6 }
  0x47   : > { %v212_v9 = vadd.f32 %v312_v4, %v204_v7 }
  0x48   : > { %213 = vst [vmem:[%s188_s17] sm:$0xff] %v211_v8 }
  0x49   : > { %214 = vst [vmem:[%s188_s17 + $0x8] sm:$0xff] %v212_v9 }
  0x4a   : > { %417 = shalt.err (!%p414_p1)
}
  0x4b   : > { %s418_s9 = scalar_lea.hbm %s621_s26, 256  ;;  %s422_s4 = scalar_lea.hbm %s667_s3, 1024 }
  0x4c   : > { %p419_p3 = scmp.ne.s32.totalorder %s621_s26, %s418_s9  ;;  %p423_p0 = scmp.lt.u32.totalorder %s621_s26, %s667_s3 }
  0x4d   : > { %p424_p2 = scmp.lt.u32.totalorder %s422_s4, %s418_s9  ;;  %p426_p6 = scmp.lt.u32.totalorder %s418_s9, %s621_s26 }
  0x4e   : > { %p420_p4 = pnand %p419_p3, %p674_p10 }
  0x4f   : > { %p425_p7 = por %p424_p2, %p423_p0 }
  0x50   : > { %p421_p5 = pneg %p420_p4 }
  0x51   : > { %p427_p11 = por %p426_p6, %p425_p7 }
  0x53   : > { %p428_p12 = pnand %p427_p11, %p421_p5 }
  0x55   : > { %431 = shalt.err (!%p428_p12)
}
  0x56   : > { %s476_s8 = smov 128   ;;  %s477_s17 = smov 8  }
  0x57   : > { %322 = dma.vmem_to_hbm [thread:$0]  (%p674_p10), %s616_s19, 256, %s621_s26, %s216_s27, %s476_s8, %s476_s8, %s477_s17  }
  0x58 PF: > { %p333_p8 = scmp.ge.s32.totalorder %s470_s15, 2  ;;  %s244_s23 = sand.u32 1, %s458_s12  }
  0x59   : > { %p675_p9 = scmp.ne.s32.totalorder %s672_s25, 0  ;;  %s245_s20 = scalar_lea.sflag [#allocation4], %s244_s23 }
  0x5b   : > { %p329_p13 = pnand %p333_p8, %p675_p9 }
  0x5d   : > { %453 = dma.done.wait (!%p329_p13), %s245_s20, 256  }
  0x5e   : > { %455 = vsyncadd (!%p329_p13), %s245_s20, 4294967040  ;;  %p16_p1 = scmp.ge.s32.totalorder %s523_s18, 6   ;;  %s676_s12 = smov %s462_s13 }
  0x5f   : > { %s677_s13 = smov %s466_s14  ;;  %s678_s14 = smov %s535_s21 }
  0x60   : > { %s679_s15 = smov %s523_s18  ;;  %18 = sbr.rel (!%p16_p1) target bundleno = 5 (0x5), region = 77 }
  0x67   :  { %250 = vsyncpa [#allocation3], 1 }
  0x68   :  { %252 = vsyncpa [#allocation3 + $0x1], 1 }
  0x69   :  { %253 = vsyncpa [#allocation4], 1 }
  0x6a   :  { %255 = vsyncpa [#allocation4 + $0x1], 1 }

</bundles_post_ra>
